<compile_context>
chip_gen: v6e
topology: v6e:2x2x1
jax: 0.10.0
libtpu: 0.0.40
codegen_flags: <defaults>
</compile_context>

<pallas_src>
import functools

import jax
import jax.numpy as jnp
import numpy as np
from jax import lax
from jax.experimental import pallas as pl
from jax.experimental.pallas import tpu as pltpu

EPS = 1e-5


def netunit_kernel(lhs_ref, wk_ref, sel_ref, selt_ref, gb_ref, out_ref, *, count):
    # lhs_ref  : (N*H, 3*W*Cin)   im2col-over-kh rows (H halo already folded in)
    # wk_ref   : (3*W*Cin, W*Cout) banded conv weights (kh taps stacked on K)
    # sel_ref  : (W*Cout, Cout)    0/1 selection: column (wo*Cout+co) -> channel co
    # selt_ref : (Cout, W*Cout)    transpose (per-channel -> columns broadcast)
    # gb_ref   : (2, Cout)         row 0 = gamma, row 1 = beta
    # out_ref  : (N*H, W*Cout)     lane-dense fused output
    # ---- conv: a single MXU matmul --------------------------------------------
    acc = jnp.dot(lhs_ref[...], wk_ref[...], preferred_element_type=jnp.float32)

    # ---- batch statistics: one sublane reduce each, one M=2 selection matmul --
    ssum = jnp.sum(acc, axis=0, keepdims=True)             # (1, W*Cout)
    ssq = jnp.sum(acc * acc, axis=0, keepdims=True)        # (1, W*Cout)
    stats = jnp.dot(jnp.concatenate([ssum, ssq], axis=0), sel_ref[...],
                    preferred_element_type=jnp.float32)    # (2, Cout)
    mean = stats[0:1, :] / count
    var = stats[1:2, :] / count - mean * mean               # biased (training-mode BN)
    inv = lax.rsqrt(var + EPS)
    scale = gb_ref[0:1, :] * inv                            # (1, Cout)
    shift = gb_ref[1:2, :] - mean * scale                   # (1, Cout)

    # ---- broadcast per-channel scale/shift back to columns: one M=2 matmul ----
    ss = jnp.dot(jnp.concatenate([scale, shift], axis=0), selt_ref[...],
                 preferred_element_type=jnp.float32)        # (2, W*Cout)

    # ---- BN + ReLU epilogue, output written exactly once -----------------------
    out_ref[...] = jnp.maximum(acc * ss[0:1, :] + ss[1:2, :], 0.0)


def net_unit_forward(x_nchw, w_oihw, b, gamma, beta):
    """ReLU(BatchNorm2d(Conv2d_3x3_s1_p1(x))) with training-mode batch statistics."""
    N, Cin, H, W = x_nchw.shape
    Cout = w_oihw.shape[0]
    WCIN, WCOUT = W * Cin, W * Cout
    K = 3 * WCIN
    NH = N * H

    # ---- host-side layout glue (tiny, ~25 KiB extra DMA) ----------------------
    # NCHW -> NHWC -> (N, H, W*Cin); pad the H halo on the host; build the
    # 3-tap im2col lhs so every in-kernel load is aligned.
    x = jnp.transpose(x_nchw, (0, 2, 3, 1)).astype(jnp.float32).reshape(N, H, WCIN)
    xp = jnp.pad(x, ((0, 0), (1, 1), (0, 0)))
    lhs = jnp.concatenate([xp[:, 0:H, :], xp[:, 1:H + 1, :], xp[:, 2:H + 2, :]],
                          axis=-1).reshape(NH, K)

    # Banded weight matrix: wk[kh*W*Cin + wi*Cin + ci, wo*Cout + co]
    #   = w[co, ci, kh, wi-wo+1] when 0 <= wi-wo+1 <= 2, else 0.
    # (W-padding of the conv is folded into the band structure.)
    wt = jnp.transpose(w_oihw.astype(jnp.float32), (2, 3, 1, 0))    # (3, 3, Cin, Cout)
    wi = jnp.arange(W)[:, None]
    wo = jnp.arange(W)[None, :]
    kw = wi - wo + 1                                                # (W, W)
    valid = ((kw >= 0) & (kw <= 2)).astype(jnp.float32)
    kw_c = jnp.clip(kw, 0, 2)
    band = wt[:, kw_c] * valid[None, :, :, None, None]              # (3, W, W, Cin, Cout)
    wk = jnp.transpose(band, (0, 1, 3, 2, 4)).reshape(K, WCOUT)

    # Conv bias is intentionally NOT used: training-mode BN subtracts the batch
    # mean, which cancels a per-channel constant exactly (variance unchanged).
    # (If this kernel were reused for inference-mode BN, the bias must be restored.)
    del b

    selt = jnp.tile(jnp.eye(Cout, dtype=jnp.float32), (1, W))       # (Cout, W*Cout)
    sel = selt.T                                                    # (W*Cout, Cout)
    gb = jnp.stack([gamma.astype(jnp.float32), beta.astype(jnp.float32)], axis=0)

    kernel = functools.partial(netunit_kernel, count=float(N * H * W))

    # Whole problem (~175 KiB) fits VMEM on every TPU generation -> single grid
    # step, one fused pallas_call, no HBM round trip between conv and BN/ReLU.
    # TODO(synk): at production shapes, re-grid over N/H (parallel) with per-core
    # partial stats so both v7x TensorCores are used and wk does not grow O(W^2).
    out = pl.pallas_call(
        kernel,
        out_shape=jax.ShapeDtypeStruct((NH, WCOUT), jnp.float32),
        grid_spec=pltpu.PrefetchScalarGridSpec(
            num_scalar_prefetch=0,
            grid=(1,),
            in_specs=[
                pl.BlockSpec((NH, K), lambda i: (0, 0)),
                pl.BlockSpec((K, WCOUT), lambda i: (0, 0)),
                pl.BlockSpec((WCOUT, Cout), lambda i: (0, 0)),
                pl.BlockSpec((Cout, WCOUT), lambda i: (0, 0)),
                pl.BlockSpec((2, Cout), lambda i: (0, 0)),
            ],
            out_specs=pl.BlockSpec((NH, WCOUT), lambda i: (0, 0)),
        ),
        compiler_params=pltpu.CompilerParams(
            dimension_semantics=("arbitrary",)),
    )(lhs, wk, sel, selt, gb)

    # (N*H, W*Cout) -> NCHW
    out = out.reshape(N, H, W, Cout)
    return jnp.transpose(out, (0, 3, 1, 2))


def reference_forward(x_nchw, w_oihw, b, gamma, beta):
    """Pure-JAX reference (NCHW) for correctness checking."""
    conv = lax.conv_general_dilated(
        x_nchw, w_oihw, window_strides=(1, 1), padding=((1, 1), (1, 1)),
        dimension_numbers=("NCHW", "OIHW", "NCHW")) + b[None, :, None, None]
    mean = jnp.mean(conv, axis=(0, 2, 3), keepdims=True)
    var = jnp.mean((conv - mean) ** 2, axis=(0, 2, 3), keepdims=True)
    y = gamma[None, :, None, None] * (conv - mean) * lax.rsqrt(var + EPS) \
        + beta[None, :, None, None]
    return jnp.maximum(y, 0.0)


if __name__ == "__main__":
    key = jax.random.PRNGKey(0)
    k_x, k_w, k_b = jax.random.split(key, 3)

    N, Cin, Cout, H, W = 2, 4, 8, 16, 16

    x = jax.random.normal(k_x, (N, Cin, H, W), dtype=jnp.float32)

    # Deterministic parameter init (shapes match nn.Conv2d / nn.BatchNorm2d defaults).
    fan_in = Cin * 3 * 3
    bound = 1.0 / np.sqrt(fan_in)
    w_conv = jax.random.uniform(k_w, (Cout, Cin, 3, 3), jnp.float32, -bound, bound)
    b_conv = jax.random.uniform(k_b, (Cout,), jnp.float32, -bound, bound)
    gamma = jnp.ones((Cout,), jnp.float32)   # BatchNorm default weight
    beta = jnp.zeros((Cout,), jnp.float32)   # BatchNorm default bias

    out = net_unit_forward(x, w_conv, b_conv, gamma, beta)
    out = jax.block_until_ready(out)

    ref = reference_forward(x, w_conv, b_conv, gamma, beta)
    np.testing.assert_allclose(np.asarray(out), np.asarray(ref), rtol=1e-4, atol=1e-4)

    print("KERNEL_OK")
</pallas_src>

<mosaic_0001>
module attributes {stable_mosaic.version = 11 : i64} {
  func.func @netunit_kernel(%arg0: i32, %arg1: memref<32x192xf32, #tpu.memory_space<vmem>>, %arg2: memref<192x128xf32, #tpu.memory_space<vmem>>, %arg3: memref<128x8xf32, #tpu.memory_space<vmem>>, %arg4: memref<8x128xf32, #tpu.memory_space<vmem>>, %arg5: memref<2x8xf32, #tpu.memory_space<vmem>>, %arg6: memref<32x128xf32, #tpu.memory_space<vmem>>) attributes {dimension_semantics = [#tpu.dimension_semantics<arbitrary>], iteration_bounds = array<i64: 1>, scalar_prefetch = 0 : i64, scratch_operands = 0 : i64, tpu.core_type = #tpu.core_type<tc>, window_params = [{pipeline_mode = #tpu.pipeline_mode<synchronous>, transform_indices = @transform_0, window_bounds = array<i64: 32, 192>}, {pipeline_mode = #tpu.pipeline_mode<synchronous>, transform_indices = @transform_1, window_bounds = array<i64: 192, 128>}, {pipeline_mode = #tpu.pipeline_mode<synchronous>, transform_indices = @transform_2, window_bounds = array<i64: 128, 8>}, {pipeline_mode = #tpu.pipeline_mode<synchronous>, transform_indices = @transform_3, window_bounds = array<i64: 8, 128>}, {pipeline_mode = #tpu.pipeline_mode<synchronous>, transform_indices = @transform_4, window_bounds = array<i64: 2, 8>}, {pipeline_mode = #tpu.pipeline_mode<synchronous>, transform_indices = @transform_5, window_bounds = array<i64: 32, 128>}]} {
    %c0 = arith.constant 0 : index
    %c0_0 = arith.constant 0 : index
    %0 = vector.load %arg1[%c0, %c0_0] : memref<32x192xf32, #tpu.memory_space<vmem>>, vector<32x192xf32>
    %c0_1 = arith.constant 0 : index
    %c0_2 = arith.constant 0 : index
    %1 = vector.load %arg2[%c0_1, %c0_2] : memref<192x128xf32, #tpu.memory_space<vmem>>, vector<192x128xf32>
    %cst = arith.constant dense<0.000000e+00> : vector<32x128xf32>
    %2 = tpu.matmul %0, %1, %cst {dimension_numbers = #tpu.dot_dimension_numbers<[1], [0], [0], [1], [0, 0, 1, 1], [], []>} : vector<32x192xf32>, vector<192x128xf32>, vector<32x128xf32> -> vector<32x128xf32>
    %cst_3 = arith.constant dense<0.000000e+00> : vector<128xf32>
    %3 = vector.multi_reduction <add>, %2, %cst_3 [0] : vector<32x128xf32> to vector<128xf32>
    %4 = vector.shape_cast %3 : vector<128xf32> to vector<1x128xf32>
    %5 = arith.mulf %2, %2 : vector<32x128xf32>
    %cst_4 = arith.constant dense<0.000000e+00> : vector<128xf32>
    %6 = vector.multi_reduction <add>, %5, %cst_4 [0] : vector<32x128xf32> to vector<128xf32>
    %7 = vector.shape_cast %6 : vector<128xf32> to vector<1x128xf32>
    %8 = tpu.concatenate %4, %7 in 0 : vector<1x128xf32>, vector<1x128xf32> -> vector<2x128xf32>
    %c0_5 = arith.constant 0 : index
    %c0_6 = arith.constant 0 : index
    %9 = vector.load %arg3[%c0_5, %c0_6] : memref<128x8xf32, #tpu.memory_space<vmem>>, vector<128x8xf32>
    %cst_7 = arith.constant dense<0.000000e+00> : vector<2x8xf32>
    %10 = tpu.matmul %8, %9, %cst_7 {dimension_numbers = #tpu.dot_dimension_numbers<[1], [0], [0], [1], [0, 0, 1, 1], [], []>} : vector<2x128xf32>, vector<128x8xf32>, vector<2x8xf32> -> vector<2x8xf32>
    %11 = vector.extract_strided_slice %10 {offsets = [0, 0], sizes = [1, 8], strides = [1, 1]} : vector<2x8xf32> to vector<1x8xf32>
    %cst_8 = arith.constant 5.120000e+02 : f32
    %12 = vector.broadcast %cst_8 : f32 to vector<1x8xf32>
    %13 = arith.divf %11, %12 : vector<1x8xf32>
    %14 = vector.extract_strided_slice %10 {offsets = [1, 0], sizes = [1, 8], strides = [1, 1]} : vector<2x8xf32> to vector<1x8xf32>
    %cst_9 = arith.constant 5.120000e+02 : f32
    %15 = vector.broadcast %cst_9 : f32 to vector<1x8xf32>
    %16 = arith.divf %14, %15 : vector<1x8xf32>
    %17 = arith.mulf %13, %13 : vector<1x8xf32>
    %18 = arith.subf %16, %17 : vector<1x8xf32>
    %cst_10 = arith.constant 9.99999974E-6 : f32
    %19 = vector.broadcast %cst_10 : f32 to vector<1x8xf32>
    %20 = arith.addf %18, %19 : vector<1x8xf32>
    %21 = math.rsqrt %20 : vector<1x8xf32>
    %c0_11 = arith.constant 0 : index
    %c0_12 = arith.constant 0 : index
    %22 = vector.load %arg5[%c0_11, %c0_12] : memref<2x8xf32, #tpu.memory_space<vmem>>, vector<1x8xf32>
    %23 = arith.mulf %22, %21 : vector<1x8xf32>
    %c1 = arith.constant 1 : index
    %c0_13 = arith.constant 0 : index
    %24 = vector.load %arg5[%c1, %c0_13] : memref<2x8xf32, #tpu.memory_space<vmem>>, vector<1x8xf32>
    %25 = arith.mulf %13, %23 : vector<1x8xf32>
    %26 = arith.subf %24, %25 : vector<1x8xf32>
    %27 = tpu.concatenate %23, %26 in 0 : vector<1x8xf32>, vector<1x8xf32> -> vector<2x8xf32>
    %c0_14 = arith.constant 0 : index
    %c0_15 = arith.constant 0 : index
    %28 = vector.load %arg4[%c0_14, %c0_15] : memref<8x128xf32, #tpu.memory_space<vmem>>, vector<8x128xf32>
    %cst_16 = arith.constant dense<0.000000e+00> : vector<2x128xf32>
    %29 = tpu.matmul %27, %28, %cst_16 {dimension_numbers = #tpu.dot_dimension_numbers<[1], [0], [0], [1], [0, 0, 1, 1], [], []>} : vector<2x8xf32>, vector<8x128xf32>, vector<2x128xf32> -> vector<2x128xf32>
    %30 = vector.extract_strided_slice %29 {offsets = [0, 0], sizes = [1, 128], strides = [1, 1]} : vector<2x128xf32> to vector<1x128xf32>
    %31 = vector.broadcast %30 : vector<1x128xf32> to vector<32x128xf32>
    %32 = arith.mulf %2, %31 : vector<32x128xf32>
    %33 = vector.extract_strided_slice %29 {offsets = [1, 0], sizes = [1, 128], strides = [1, 1]} : vector<2x128xf32> to vector<1x128xf32>
    %34 = vector.broadcast %33 : vector<1x128xf32> to vector<32x128xf32>
    %35 = arith.addf %32, %34 : vector<32x128xf32>
    %cst_17 = arith.constant 0.000000e+00 : f32
    %36 = vector.broadcast %cst_17 : f32 to vector<32x128xf32>
    %37 = arith.maximumf %35, %36 : vector<32x128xf32>
    %c0_18 = arith.constant 0 : index
    %c0_19 = arith.constant 0 : index
    %38 = vector.load %arg6[%c0_18, %c0_19] : memref<32x128xf32, #tpu.memory_space<vmem>>, vector<32x128xf32>
    tpu.vector_store %arg6[%c0_18, %c0_19], %37 {strides = array<i32>} : memref<32x128xf32, #tpu.memory_space<vmem>>, vector<32x128xf32>,
    return
  }
  func.func @transform_0(%arg0: i32) -> (i32, i32) {
    %c0_i32 = arith.constant 0 : i32
    %c0_i32_0 = arith.constant 0 : i32
    %c0_i32_1 = arith.constant 0 : i32
    return %c0_i32, %c0_i32_0 : i32, i32
  }
  func.func @transform_1(%arg0: i32) -> (i32, i32) {
    %c0_i32 = arith.constant 0 : i32
    %c0_i32_0 = arith.constant 0 : i32
    %c0_i32_1 = arith.constant 0 : i32
    return %c0_i32, %c0_i32_0 : i32, i32
  }
  func.func @transform_2(%arg0: i32) -> (i32, i32) {
    %c0_i32 = arith.constant 0 : i32
    %c0_i32_0 = arith.constant 0 : i32
    %c0_i32_1 = arith.constant 0 : i32
    return %c0_i32, %c0_i32_0 : i32, i32
  }
  func.func @transform_3(%arg0: i32) -> (i32, i32) {
    %c0_i32 = arith.constant 0 : i32
    %c0_i32_0 = arith.constant 0 : i32
    %c0_i32_1 = arith.constant 0 : i32
    return %c0_i32, %c0_i32_0 : i32, i32
  }
  func.func @transform_4(%arg0: i32) -> (i32, i32) {
    %c0_i32 = arith.constant 0 : i32
    %c0_i32_0 = arith.constant 0 : i32
    %c0_i32_1 = arith.constant 0 : i32
    return %c0_i32, %c0_i32_0 : i32, i32
  }
  func.func @transform_5(%arg0: i32) -> (i32, i32) {
    %c0_i32 = arith.constant 0 : i32
    %c0_i32_0 = arith.constant 0 : i32
    %c0_i32_1 = arith.constant 0 : i32
    return %c0_i32, %c0_i32_0 : i32, i32
  }
}

</mosaic_0001>

<bundles_post_ra>
// kernel: tpu_custom_call.1
= control target key start
LH: loop header
LB: loop body
LE: loop exit
PB: predicated region body
PF: predicated region fallthrough
CT: control target
= control target key end

     0   :  { %10 = vsyncpa [#allocation3], 0  ;;  %s714_s0 = inlined_call_operand.vmem [shape: f32[32,192], index: 0, kind: input, shape index: {}]   ;;  %s715_s1 = inlined_call_operand.hbm [shape: f32[192,128], index: 1, kind: input, shape index: {}]   ;;  %s716_s2 = inlined_call_operand.vmem [shape: f32[128,8], index: 2, kind: input, shape index: {}]   ;;  %s717_s3 = inlined_call_operand.vmem [shape: f32[8,128], index: 3, kind: input, shape index: {}]   ;;  %s718_s4 = inlined_call_operand.vmem [shape: f32[2,8], index: 4, kind: input, shape index: {}]   ;;  %s719_s5 = inlined_call_operand.hbm [shape: f32[32,128], index: 5, kind: output, shape index: {}]  }
   0x1   :  { %11 = vsyncpa [#allocation4], 0  ;;  %s528_s18 = smov [#allocation2]  }
   0x2   :  { %s19_s19 = sshll.u32 %s528_s18, 4  ;;  %s20_s19 = int_to_ptr.vmem [resolvable:$true] %s19_s19 }
   0x3   :  { %s492_s20 = scalar_lea.vmem %s20_s19, 3072  ;;  %p497_p1 = scmp.lt.s32.totalorder %s20_s19, %s20_s19 }
   0x4   :  { %p493_p0 = scmp.ne.s32.totalorder %s20_s19, %s492_s20  ;;  %p498_p2 = scmp.lt.s32.totalorder %s492_s20, %s492_s20 }
   0x6   :  { %p499_p3 = por %p498_p2, %p497_p1 }
   0x8   :  { %p500_p4 = pnand %p499_p3, %p493_p0 }
   0xa   :  { %503 = shalt.err (!%p500_p4)
}
   0xb   :  { %s529_s21 = smov 128   ;;  %s530_s22 = smov 8  }
   0xc   :  { %25 = dma.hbm_to_vmem [thread:$0]  %s715_s1, 3072, %s20_s19, [#allocation3], %s529_s21, %s529_s21, %s530_s22  }
   0xd   :  { %524 = dma.done.wait [#allocation3], 3072  }
   0xe   :  { %525 = vsyncadd [#allocation3], 4294964224  ;;  %v531_v0 = vmov 0.0   ;;  %v58_v1 = vld [vmem:[#allocation2 + $0x78] sm:$0xff]  ;;  %v57_v2 = vld [vmem:[#allocation2 + $0x70] sm:$0xff]  ;;  %vm67_vm0 = vcmask 523264  }
   0xf   :  { %80 = vmatprep.subr.mxu0 %v531_v0  ;;  %436 = vmatprep.subr.mxu1 %v531_v0  ;;  %v56_v3 = vld [vmem:[#allocation2 + $0x68] sm:$0xff]  ;;  %v55_v4 = vld [vmem:[#allocation2 + $0x60] sm:$0xff]  ;;  %v54_v5 = vld [vmem:[#allocation2 + $0x58] sm:$0xff]  ;;  %vm532_vm1 = vmmov 0   ;;  %vm187_vm2 = vcmask 1040384   ;;  %vm297_vm3 = vcmask 64512  }
  0x10   :  { %81 = vmatpush1.msra.mxu0 %v58_v1  ;;  %v53_v6 = vld [vmem:[#allocation2 + $0x50] sm:$0xff]  ;;  %v36_v7 = vld [vmem:[%s714_s0 + $0x8] sm:$0xff]  ;;  %v204_v9 = vld [vmem:[%s716_s2 + $0x78] sm:$0xff]  ;;  %468 = vmatprep.mubr.msk.f32.mxu1 %vm532_vm1, %v531_v0 }
  0x11   :  { %82 = vmatprep.subr.mxu0 %v531_v0  ;;  %412 = vmatprep.mubr.msk.f32.mxu0 %vm67_vm0, %v36_v7  ;;  %v52_v8 = vld [vmem:[#allocation2 + $0x48] sm:$0xff]  ;;  %v51_v10 = vld [vmem:[#allocation2 + $0x40] sm:$0xff]  ;;  %v50_v11 = vld [vmem:[#allocation2 + $0x38] sm:$0xff] }
  0x12   :  { %83 = vmatpush1.msra.mxu0 %v57_v2  ;;  %437 = vmatpush3.msra.mxu1 %v204_v9  ;;  %v49_v12 = vld [vmem:[#allocation2 + $0x30] sm:$0xff]  ;;  %v48_v13 = vld [vmem:[#allocation2 + $0x28] sm:$0xff]  ;;  %v47_v14 = vld [vmem:[#allocation2 + $0x20] sm:$0xff] }
  0x13   :  { %84 = vmatprep.subr.mxu0 %v531_v0  ;;  %438 = vmatprep.subr.mxu1 %v531_v0  ;;  %v46_v15 = vld [vmem:[#allocation2 + $0x18] sm:$0xff]  ;;  %v45_v16 = vld [vmem:[#allocation2 + $0x10] sm:$0xff]  ;;  %v44_v17 = vld [vmem:[#allocation2 + $0x8] sm:$0xff] }
  0x14   :  { %85 = vmatpush1.msra.mxu0 %v56_v3  ;;  %v43_v18 = vld [vmem:[#allocation2] sm:$0xff]  ;;  %v66_v19 = vld [vmem:[#allocation2 + $0xb8] sm:$0xff]  ;;  %v65_v20 = vld [vmem:[#allocation2 + $0xb0] sm:$0xff] }
  0x15   :  { %86 = vmatprep.subr.mxu0 %v531_v0  ;;  %v64_v21 = vld [vmem:[#allocation2 + $0xa8] sm:$0xff]  ;;  %v63_v22 = vld [vmem:[#allocation2 + $0xa0] sm:$0xff]  ;;  %v62_v23 = vld [vmem:[#allocation2 + $0x98] sm:$0xff] }
  0x16   :  { %87 = vmatpush1.msra.mxu0 %v55_v4  ;;  %v61_v24 = vld [vmem:[#allocation2 + $0x90] sm:$0xff]  ;;  %v60_v25 = vld [vmem:[#allocation2 + $0x88] sm:$0xff]  ;;  %v59_v26 = vld [vmem:[#allocation2 + $0x80] sm:$0xff] }
  0x17   :  { %88 = vmatprep.subr.mxu0 %v531_v0  ;;  %v35_v27 = vld [vmem:[%s714_s0] sm:$0xff]  ;;  %v38_v28 = vld [vmem:[%s714_s0 + $0x18] sm:$0xff]  ;;  %v37_v29 = vld [vmem:[%s714_s0 + $0x10] sm:$0xff] }
  0x18   :  { %89 = vmatpush1.msra.mxu0 %v54_v5  ;;  %v40_v30 = vld [vmem:[%s714_s0 + $0x28] sm:$0xff]  ;;  %v39_v31 = vld [vmem:[%s714_s0 + $0x20] sm:$0xff]  ;;  %v42_v32 = vld [vmem:[%s714_s0 + $0x38] sm:$0xff] }
  0x19   :  { %90 = vmatprep.subr.mxu0 %v531_v0  ;;  %v41_v33 = vld [vmem:[%s714_s0 + $0x30] sm:$0xff]  ;;  %v202_v35 = vld [vmem:[%s716_s2 + $0x68] sm:$0xff]  ;;  %v201_v36 = vld [vmem:[%s716_s2 + $0x60] sm:$0xff] }
  0x1a   :  { %91 = vmatpush1.msra.mxu0 %v53_v6  ;;  %v203_v34 = vld [vmem:[%s716_s2 + $0x70] sm:$0xff]  ;;  %v200_v37 = vld [vmem:[%s716_s2 + $0x58] sm:$0xff]  ;;  %v198_v39 = vld [vmem:[%s716_s2 + $0x48] sm:$0xff] }
  0x1b   :  { %92 = vmatprep.subr.mxu0 %v531_v0  ;;  %439 = vmatpush3.msra.mxu1 %v203_v34  ;;  %v199_v38 = vld [vmem:[%s716_s2 + $0x50] sm:$0xff]  ;;  %v197_v40 = vld [vmem:[%s716_s2 + $0x40] sm:$0xff]  ;;  %v196_v41 = vld [vmem:[%s716_s2 + $0x38] sm:$0xff] }
  0x1c   :  { %93 = vmatpush1.msra.mxu0 %v52_v8  ;;  %440 = vmatprep.subr.mxu1 %v531_v0  ;;  %v195_v42 = vld [vmem:[%s716_s2 + $0x30] sm:$0xff]  ;;  %v194_v43 = vld [vmem:[%s716_s2 + $0x28] sm:$0xff]  ;;  %v193_v44 = vld [vmem:[%s716_s2 + $0x20] sm:$0xff] }
  0x1d   :  { %94 = vmatprep.subr.mxu0 %v531_v0  ;;  %441 = vmatpush3.msra.mxu1 %v202_v35  ;;  %v192_v45 = vld [vmem:[%s716_s2 + $0x18] sm:$0xff]  ;;  %v191_v46 = vld [vmem:[%s716_s2 + $0x10] sm:$0xff]  ;;  %v190_v47 = vld [vmem:[%s716_s2 + $0x8] sm:$0xff] }
  0x1e   :  { %95 = vmatpush1.msra.mxu0 %v51_v10  ;;  %442 = vmatprep.subr.mxu1 %v531_v0  ;;  %v189_v48 = vld [vmem:[%s716_s2] sm:$0xff] }
  0x1f   :  { %96 = vmatprep.subr.mxu0 %v531_v0  ;;  %443 = vmatpush3.msra.mxu1 %v201_v36 }
  0x20   :  { %97 = vmatpush1.msra.mxu0 %v50_v11  ;;  %444 = vmatprep.subr.mxu1 %v531_v0 }
  0x21   :  { %98 = vmatprep.subr.mxu0 %v531_v0  ;;  %445 = vmatpush3.msra.mxu1 %v200_v37 }
  0x22   :  { %99 = vmatpush1.msra.mxu0 %v49_v12  ;;  %446 = vmatprep.subr.mxu1 %v531_v0 }
  0x23   :  { %100 = vmatprep.subr.mxu0 %v531_v0  ;;  %447 = vmatpush3.msra.mxu1 %v199_v38 }
  0x24   :  { %101 = vmatpush1.msra.mxu0 %v48_v13  ;;  %448 = vmatprep.subr.mxu1 %v531_v0 }
  0x25   :  { %102 = vmatprep.subr.mxu0 %v531_v0  ;;  %449 = vmatpush3.msra.mxu1 %v198_v39 }
  0x26   :  { %103 = vmatpush1.msra.mxu0 %v47_v14  ;;  %450 = vmatprep.subr.mxu1 %v531_v0 }
  0x27   :  { %104 = vmatprep.subr.mxu0 %v531_v0  ;;  %451 = vmatpush3.msra.mxu1 %v197_v40 }
  0x28   :  { %105 = vmatpush1.msra.mxu0 %v46_v15  ;;  %452 = vmatprep.subr.mxu1 %v531_v0 }
  0x29   :  { %106 = vmatprep.subr.mxu0 %v531_v0  ;;  %453 = vmatpush3.msra.mxu1 %v196_v41 }
  0x2a   :  { %107 = vmatpush1.msra.mxu0 %v45_v16  ;;  %454 = vmatprep.subr.mxu1 %v531_v0 }
  0x2b   :  { %108 = vmatprep.subr.mxu0 %v531_v0  ;;  %455 = vmatpush3.msra.mxu1 %v195_v42 }
  0x2c   :  { %109 = vmatpush1.msra.mxu0 %v44_v17  ;;  %456 = vmatprep.subr.mxu1 %v531_v0  ;;  %v296_v17 = vld [vmem:[%s717_s3] sm:$0xff]  ;;  %s533_s3 = smov [#allocation5]  }
  0x2d   :  { %110 = vmatprep.subr.mxu0 %v531_v0  ;;  %457 = vmatpush3.msra.mxu1 %v194_v43 }
  0x2e   :  { %111 = vmatpush1.msra.mxu0 %v43_v18  ;;  %458 = vmatprep.subr.mxu1 %v531_v0 }
  0x2f   :  { %128 = vmatprep.subr.mxu0 %v531_v0  ;;  %459 = vmatpush3.msra.mxu1 %v193_v44 }
  0x30   :  { %129 = vmatpush2.msra.mxu0 %v66_v19  ;;  %460 = vmatprep.subr.mxu1 %v531_v0 }
  0x31   :  { %130 = vmatprep.subr.mxu0 %v531_v0  ;;  %461 = vmatpush3.msra.mxu1 %v192_v45 }
  0x32   :  { %131 = vmatpush2.msra.mxu0 %v65_v20  ;;  %462 = vmatprep.subr.mxu1 %v531_v0 }
  0x33   :  { %132 = vmatprep.subr.mxu0 %v531_v0  ;;  %463 = vmatpush3.msra.mxu1 %v191_v46 }
  0x34   :  { %133 = vmatpush2.msra.mxu0 %v64_v21  ;;  %464 = vmatprep.subr.mxu1 %v531_v0 }
  0x35   :  { %134 = vmatprep.subr.mxu0 %v531_v0  ;;  %465 = vmatpush3.msra.mxu1 %v190_v47 }
  0x36   :  { %135 = vmatpush2.msra.mxu0 %v63_v22  ;;  %466 = vmatprep.subr.mxu1 %v531_v0 }
  0x37   :  { %136 = vmatprep.subr.mxu0 %v531_v0  ;;  %467 = vmatpush3.msra.mxu1 %v189_v48 }
  0x38   :  { %137 = vmatpush2.msra.mxu0 %v62_v23  ;;  %471 = vmatprep.subr.mxu1 %v531_v0 }
  0x39   :  { %138 = vmatprep.subr.mxu0 %v531_v0 }
  0x3a   :  { %139 = vmatpush2.msra.mxu0 %v61_v24 }
  0x3b   :  { %140 = vmatprep.subr.mxu0 %v531_v0 }
  0x3c   :  { %141 = vmatpush2.msra.mxu0 %v60_v25 }
  0x3d   :  { %142 = vmatprep.subr.mxu0 %v531_v0 }
  0x3e   :  { %143 = vmatpush2.msra.mxu0 %v59_v26  ;;  %v284_v26 = vld [vmem:[%s718_s4] sm:$0x1] }
  0x3f   :  { %145 = vmatmul.mubr.f32.vlgmr.msra.gmra.mxu0 %v35_v27 }
  0x40   :  { %413 = vmatprep.mubr.msk.f32.mxu0 %vm67_vm0, %v38_v28  ;;  %v289_v28 = vld [vmem:[%s718_s4 + $0x1] sm:$0x1]  ;;  %s400_s4 = sshll.u32 %s533_s3, 4  ;;  %s401_s4 = int_to_ptr.vmem [resolvable:$true] %s400_s4 }
  0x41   :  { %s504_s27 = scalar_lea.vmem %s401_s4, 512  ;;  %p509_p6 = scmp.lt.s32.totalorder %s401_s4, %s401_s4 }
  0x42   :  { %p505_p5 = scmp.ne.s32.totalorder %s401_s4, %s504_s27  ;;  %p510_p7 = scmp.lt.s32.totalorder %s504_s27, %s504_s27 }
  0x43   :  { %150 = vmatmul.mubr.f32.gmra.mxu0 %v37_v29 }
  0x44   :  { %414 = vmatprep.mubr.msk.f32.mxu0 %vm67_vm0, %v40_v30  ;;  %p511_p8 = por %p510_p7, %p509_p6 }
  0x46   :  { %p512_p9 = pnand %p511_p8, %p505_p5 }
  0x47   :  { %155 = vmatmul.mubr.f32.gmra.mxu0 %v39_v31 }
  0x48   :  { %415 = vmatprep.mubr.msk.f32.mxu0 %vm67_vm0, %v42_v32 }
  0x4b   :  { %160 = vmatmul.mubr.f32.gmra.mxu0 %v41_v33  ;;  %v371_v33 = vlaneseq }
  0x4d   :  { %v372_v34 = vshrl.u32 %v371_v33, 7 }
  0x4f   :  { %v373_v35 = vsub.s32 0, %v372_v34  ;;  %v381_v36 = vsub.s32 1, %v372_v34 }
  0xff   :  { %v689_v49 = vpop.f32.mrf.mxu0 }
 0x100   :  { %v174_v55 = vmul.f32 %v689_v49, %v689_v49 }
 0x101   :  { %v148_v50 = vpop.f32.mrf.mxu0 }
 0x103   :  { %v151_v51 = vpop.f32.mrf.mxu0 }
 0x104   :  { %v175_v53 = vmul.f32 %v151_v51, %v151_v51  ;;  %v165_v56 = vadd.f32 %v151_v51, %v689_v49 }
 0x105   :  { %v153_v52 = vpop.f32.mrf.mxu0 }
 0x106   :  { %v178_v59 = vadd.f32 %v175_v53, %v174_v55 }
 0x107   :  { %v156_v54 = vpop.f32.mrf.mxu0 }
 0x108   :  { %v176_v57 = vmul.f32 %v156_v54, %v156_v54  ;;  %v166_v60 = vadd.f32 %v165_v56, %v156_v54 }
 0x109   :  { %v158_v58 = vpop.f32.mrf.mxu0 }
 0x10a   :  { %v179_v62 = vadd.f32 %v178_v59, %v176_v57 }
 0x10b   :  { %v161_v61 = vpop.f32.mrf.mxu0 }
 0x10c   :  { %v167_v63 = vadd.f32 %v166_v60, %v161_v61  ;;  %v177_v1 = vmul.f32 %v161_v61, %v161_v61 }
 0x10d   :  { %v163_v2 = vpop.f32.mrf.mxu0 }
 0x10e   :  { %v168_v3 = vrot.slane %v167_v63, 4  ;;  %v180_v4 = vadd.f32 %v179_v62, %v177_v1 }
 0x110   :  { %v169_v5 = vadd.f32 %v168_v3, %v167_v63  ;;  %v181_v6 = vrot.slane %v180_v4, 4 }
 0x112   :  { %v170_v7 = vrot.slane %v169_v5, 2  ;;  %v182_v8 = vadd.f32 %v181_v6, %v180_v4 }
 0x114   :  { %v171_v9 = vadd.f32 %v170_v7, %v169_v5  ;;  %v183_v10 = vrot.slane %v182_v8, 2 }
 0x116   :  { %v172_v11 = vrot.slane %v171_v9, 1  ;;  %v184_v12 = vadd.f32 %v183_v10, %v182_v8 }
 0x118   :  { %v185_v13 = vrot.slane %v184_v12, 1  ;;  %v173_v14 = vadd.f32 %v172_v11, %v171_v9 }
 0x11a   :  { %v186_v15 = vadd.f32 %v185_v13, %v184_v12 }
 0x11c   :  { %v188_v16 = vsel %vm187_vm2, %v173_v14, %v186_v15 }
 0x11d   :  { %469 = vmatmul.mubr.f32.vlgmr.msra.gmra.mxu1 %v188_v16 }
 0x11e   :  { %473 = vmatprep.mubr.msk.f32.mxu1 %vm532_vm1, %v531_v0  ;;  %472 = vmatpush3.msra.mxu1 %v296_v17 }
 0x1dd   :  { %v271_v18 = vpop.f32.mrf.mxu1 }
 0x1de   :  { %v276_v19 = vmul.f32 0.001953125, %v271_v18 }
 0x1df   :  { %v470_v20 = vpop.f32.mrf.mxu1 }
 0x1e0   :  { %v277_v21 = vmul.f32 %v276_v19, %v276_v19 }
 0x1e2   :  { %v279_v22 = vrot.slane %v277_v21, 7 }
 0x1e4   :  { %v281_v23 = vsub.f32 %v276_v19, %v279_v22 }
 0x1e6   :  { %v282_v24 = vadd.f32 1e-05, %v281_v23 }
 0x1e8   :  { %482 = vrsqrt.f32 %v282_v24 }
 0x1f5   :  { %v483_v25 = vpop.eup %482 }
 0x1f6   :  { %v286_v27 = vrot.slane %v483_v25, 1 }
 0x1f8   :  { %v288_v0 = vmul.f32 %v286_v27, %v284_v26 }
 0x1fa   :  { %v290_v29 = vmul.f32 %v288_v0, %v276_v19 }
 0x1fc   :  { %v291_v30 = vsub.f32 %v289_v28, %v290_v29 }
 0x1fe   :  { %v293_v31 = vrot.slane %v291_v30, 7 }
 0x200   :  { %v295_v32 = vsel %vm187_vm2, %v288_v0, %v293_v31 }
 0x201   :  { %474 = vmatmul.mubr.msk.f32.vlgmr.msra.gmra.mxu1 %vm297_vm3, %v295_v32 }
 0x2c1   :  { %v367_v37 = vpop.f32.mrf.mxu1 }
 0x2c2   :  { %v374_v38 = vrot.slane %v367_v37, %v373_v35  ;;  %v382_v39 = vrot.slane %v367_v37, %v381_v36 }
 0x2c3   :  { %v475_v40 = vpop.f32.mrf.mxu1 }
 0x2c4   :  { %v375_v41 = vmul.f32 %v374_v38, %v689_v49  ;;  %v376_v42 = vmul.f32 %v374_v38, %v151_v51  ;;  %v377_v43 = vmul.f32 %v374_v38, %v156_v54  ;;  %v378_v44 = vmul.f32 %v374_v38, %v161_v61 }
 0x2c6   :  { %v383_v45 = vadd.f32 %v382_v39, %v375_v41  ;;  %v384_v46 = vadd.f32 %v382_v39, %v376_v42  ;;  %v385_v47 = vadd.f32 %v382_v39, %v377_v43  ;;  %v386_v48 = vadd.f32 %v382_v39, %v378_v44 }
 0x2c8   :  { %v387_v50 = vmax.f32 %v383_v45, 0.0  ;;  %v388_v52 = vmax.f32 %v384_v46, 0.0  ;;  %v389_v53 = vmax.f32 %v385_v47, 0.0  ;;  %v390_v55 = vmax.f32 %v386_v48, 0.0 }
 0x2ca   :  { %391 = vst [vmem:[#allocation5] sm:$0xff] %v387_v50  ;;  %392 = vst [vmem:[#allocation5 + $0x8] sm:$0xff] %v388_v52 }
 0x2cb   :  { %393 = vst [vmem:[#allocation5 + $0x10] sm:$0xff] %v389_v53  ;;  %394 = vst [vmem:[#allocation5 + $0x18] sm:$0xff] %v390_v55 }
 0x2cc   :  { %515 = shalt.err (!%p512_p9)
}
 0x2cd   :  { %406 = dma.vmem_to_hbm [thread:$0]  %s401_s4, 512, %s719_s5, [#allocation4], %s529_s21, %s529_s21, %s530_s22  }
 0x2ce   :  { %526 = dma.done.wait [#allocation4], 512  }
 0x2cf   :  { %527 = vsyncadd [#allocation4], 4294966784 }
 0x2d0   :  { %410 = vsyncpa [#allocation3], 1 }
 0x2d1   :  { %411 = vsyncpa [#allocation4], 1 }

</bundles_post_ra>
